<compile_context>
chip_gen: v6e
topology: v6e:2x2x1
jax: 0.10.0
libtpu: 0.0.40
codegen_flags: <defaults>
</compile_context>

<pallas_src>
import math

import jax
import jax.numpy as jnp
from jax import lax
from jax.experimental import pallas as pl
from jax.experimental.pallas import tpu as pltpu


def _mlp_kernel(x_ref, w1_ref, b1_ref, w2_ref, b2_ref,
                w3_ref, b3_ref, w4_ref, b4_ref, o_ref):
    x = x_ref[...]                                   # [block_b, 20] (batch-major tile)

    # Layer 1: contract the feature dim (last of both) -> feature-major [64, block_b].
    z = lax.dot_general(w1_ref[...], x,
                        dimension_numbers=(((1,), (1,)), ((), ())),
                        preferred_element_type=jnp.float32) + b1_ref[...]
    z = jnp.tanh(z)

    # Remaining layers stay feature-major: z = act(W @ z + b).
    z = jnp.tanh(
        jnp.dot(w2_ref[...], z, preferred_element_type=jnp.float32) + b2_ref[...])
    z = jnp.tanh(
        jnp.dot(w3_ref[...], z, preferred_element_type=jnp.float32) + b3_ref[...])
    logits = jnp.dot(w4_ref[...], z,
                     preferred_element_type=jnp.float32) + b4_ref[...]
    # TODO(synk): an approx-reciprocal sigmoid would shave EUP cycles; kept exact
    # to preserve the 1e-5-class numerical check.
    o_ref[...] = jax.nn.sigmoid(logits).astype(o_ref.dtype)          # [1, block_b]


def _round_up(n, m):
    return ((n + m - 1) // m) * m


def net_forward(x, params, *, block_b=512):
    """x: [B, 20] float32 -> [B, 1] float32.

    params: list of (W, b) with W shaped [out, in] (PyTorch nn.Linear layout)
    and b shaped [out].
    """
    assert block_b % 128 == 0, "batch tile must be a multiple of 128 (lane axis)"
    (w1, b1), (w2, b2), (w3, b3), (w4, b4) = params
    B, D_in = x.shape
    assert D_in == w1.shape[1]

    # Adaptive batch tile: single grid step for small batches, 512-wide tiles
    # for large ones.  Pad the batch to a multiple of the tile (zero rows are
    # sliced off at the end).
    bb = min(block_b, _round_up(B, 128))
    B_pad = _round_up(B, bb)
    x_pad = jnp.pad(x, ((0, B_pad - B), (0, 0)))                      # [B_pad, 20]

    # Biases as [out, 1] columns: broadcast over the lane (batch) axis.
    b1c, b2c, b3c, b4c = (b.reshape(-1, 1) for b in (b1, b2, b3, b4))

    def bcast_spec(shape):
        # Whole-array block, same block every grid step (weights/biases).
        return pl.BlockSpec(shape, lambda i: (0,) * len(shape))

    n_out = w4.shape[0]
    grid = (B_pad // bb,)
    outT = pl.pallas_call(
        _mlp_kernel,
        out_shape=jax.ShapeDtypeStruct((n_out, B_pad), jnp.float32),
        grid_spec=pltpu.PrefetchScalarGridSpec(
            num_scalar_prefetch=0,
            grid=grid,
            in_specs=[
                pl.BlockSpec((bb, D_in), lambda i: (i, 0)),           # x tile
                bcast_spec(w1.shape), bcast_spec(b1c.shape),
                bcast_spec(w2.shape), bcast_spec(b2c.shape),
                bcast_spec(w3.shape), bcast_spec(b3c.shape),
                bcast_spec(w4.shape), bcast_spec(b4c.shape),
            ],
            out_specs=pl.BlockSpec((n_out, bb), lambda i: (0, i)),
        ),
        compiler_params=pltpu.CompilerParams(
            dimension_semantics=("parallel",)),
    )(x_pad, w1, b1c, w2, b2c, w3, b3c, w4, b4c)

    # Back to the PyTorch-facing [B, 1] layout (drop batch padding).
    return outT[:, :B].T


def xavier_uniform(key, fan_out, fan_in, dtype=jnp.float32):
    # Matches torch.nn.init.xavier_uniform_ (gain=1) on a [out, in] weight:
    # U(-a, a), a = sqrt(6 / (fan_in + fan_out)).
    a = math.sqrt(6.0 / (fan_in + fan_out))
    return jax.random.uniform(key, (fan_out, fan_in), dtype, minval=-a, maxval=a)


def init_params(key):
    ks = jax.random.split(key, 4)
    dims = [(20, 64), (64, 32), (32, 16), (16, 1)]   # (in, out)
    params = []
    for k, (fi, fo) in zip(ks, dims):
        w = xavier_uniform(k, fo, fi)                # [out, in], PyTorch layout
        b = jnp.zeros((fo,), jnp.float32)
        params.append((w, b))
    return params


def net_forward_ref(x, params):
    (w1, b1), (w2, b2), (w3, b3), (w4, b4) = params
    z = jnp.tanh(x @ w1.T + b1)
    z = jnp.tanh(z @ w2.T + b2)
    z = jnp.tanh(z @ w3.T + b3)
    return jax.nn.sigmoid(z @ w4.T + b4)


if __name__ == "__main__":
    key = jax.random.PRNGKey(0)
    kp, kx = jax.random.split(key)
    params = init_params(kp)

    B = 8
    x = jax.random.normal(kx, (B, 20), jnp.float32)

    out = net_forward(x, params)
    out = jax.block_until_ready(out)

    ref = net_forward_ref(x, params)
    assert out.shape == (B, 1), out.shape
    assert jnp.allclose(out, ref, atol=2e-5, rtol=2e-5), "mismatch vs reference"

    print("KERNEL_OK")
</pallas_src>

<mosaic_0001>
module attributes {stable_mosaic.version = 11 : i64} {
  func.func @_mlp_kernel(%arg0: i32, %arg1: memref<128x20xf32, #tpu.memory_space<vmem>>, %arg2: memref<64x20xf32, #tpu.memory_space<vmem>>, %arg3: memref<64x1xf32, #tpu.memory_space<vmem>>, %arg4: memref<32x64xf32, #tpu.memory_space<vmem>>, %arg5: memref<32x1xf32, #tpu.memory_space<vmem>>, %arg6: memref<16x32xf32, #tpu.memory_space<vmem>>, %arg7: memref<16x1xf32, #tpu.memory_space<vmem>>, %arg8: memref<1x16xf32, #tpu.memory_space<vmem>>, %arg9: memref<1x1xf32, #tpu.memory_space<vmem>>, %arg10: memref<1x128xf32, #tpu.memory_space<vmem>>) attributes {dimension_semantics = [#tpu.dimension_semantics<parallel>], iteration_bounds = array<i64: 1>, scalar_prefetch = 0 : i64, scratch_operands = 0 : i64, tpu.core_type = #tpu.core_type<tc>, window_params = [{transform_indices = @transform_0, window_bounds = array<i64: 128, 20>}, {pipeline_mode = #tpu.pipeline_mode<synchronous>, transform_indices = @transform_1, window_bounds = array<i64: 64, 20>}, {pipeline_mode = #tpu.pipeline_mode<synchronous>, transform_indices = @transform_2, window_bounds = array<i64: 64, 1>}, {pipeline_mode = #tpu.pipeline_mode<synchronous>, transform_indices = @transform_3, window_bounds = array<i64: 32, 64>}, {pipeline_mode = #tpu.pipeline_mode<synchronous>, transform_indices = @transform_4, window_bounds = array<i64: 32, 1>}, {pipeline_mode = #tpu.pipeline_mode<synchronous>, transform_indices = @transform_5, window_bounds = array<i64: 16, 32>}, {pipeline_mode = #tpu.pipeline_mode<synchronous>, transform_indices = @transform_6, window_bounds = array<i64: 16, 1>}, {pipeline_mode = #tpu.pipeline_mode<synchronous>, transform_indices = @transform_7, window_bounds = array<i64: 1, 16>}, {pipeline_mode = #tpu.pipeline_mode<synchronous>, transform_indices = @transform_8, window_bounds = array<i64: 1, 1>}, {transform_indices = @transform_9, window_bounds = array<i64: 1, 128>}]} {
    %c0 = arith.constant 0 : index
    %c0_0 = arith.constant 0 : index
    %0 = vector.load %arg1[%c0, %c0_0] : memref<128x20xf32, #tpu.memory_space<vmem>>, vector<128x20xf32>
    %c0_1 = arith.constant 0 : index
    %c0_2 = arith.constant 0 : index
    %1 = vector.load %arg2[%c0_1, %c0_2] : memref<64x20xf32, #tpu.memory_space<vmem>>, vector<64x20xf32>
    %cst = arith.constant dense<0.000000e+00> : vector<64x128xf32>
    %2 = tpu.matmul %1, %0, %cst {dimension_numbers = #tpu.dot_dimension_numbers<[1], [1], [0], [0], [0, 0, 1, 0], [], []>} : vector<64x20xf32>, vector<128x20xf32>, vector<64x128xf32> -> vector<64x128xf32>
    %c0_3 = arith.constant 0 : index
    %c0_4 = arith.constant 0 : index
    %3 = vector.load %arg3[%c0_3, %c0_4] : memref<64x1xf32, #tpu.memory_space<vmem>>, vector<64x1xf32>
    %4 = vector.broadcast %3 : vector<64x1xf32> to vector<64x128xf32>
    %5 = arith.addf %2, %4 : vector<64x128xf32>
    %6 = math.tanh %5 : vector<64x128xf32>
    %c0_5 = arith.constant 0 : index
    %c0_6 = arith.constant 0 : index
    %7 = vector.load %arg4[%c0_5, %c0_6] : memref<32x64xf32, #tpu.memory_space<vmem>>, vector<32x64xf32>
    %cst_7 = arith.constant dense<0.000000e+00> : vector<32x128xf32>
    %8 = tpu.matmul %7, %6, %cst_7 {dimension_numbers = #tpu.dot_dimension_numbers<[1], [0], [0], [1], [0, 0, 1, 1], [], []>} : vector<32x64xf32>, vector<64x128xf32>, vector<32x128xf32> -> vector<32x128xf32>
    %c0_8 = arith.constant 0 : index
    %c0_9 = arith.constant 0 : index
    %9 = vector.load %arg5[%c0_8, %c0_9] : memref<32x1xf32, #tpu.memory_space<vmem>>, vector<32x1xf32>
    %10 = vector.broadcast %9 : vector<32x1xf32> to vector<32x128xf32>
    %11 = arith.addf %8, %10 : vector<32x128xf32>
    %12 = math.tanh %11 : vector<32x128xf32>
    %c0_10 = arith.constant 0 : index
    %c0_11 = arith.constant 0 : index
    %13 = vector.load %arg6[%c0_10, %c0_11] : memref<16x32xf32, #tpu.memory_space<vmem>>, vector<16x32xf32>
    %cst_12 = arith.constant dense<0.000000e+00> : vector<16x128xf32>
    %14 = tpu.matmul %13, %12, %cst_12 {dimension_numbers = #tpu.dot_dimension_numbers<[1], [0], [0], [1], [0, 0, 1, 1], [], []>} : vector<16x32xf32>, vector<32x128xf32>, vector<16x128xf32> -> vector<16x128xf32>
    %c0_13 = arith.constant 0 : index
    %c0_14 = arith.constant 0 : index
    %15 = vector.load %arg7[%c0_13, %c0_14] : memref<16x1xf32, #tpu.memory_space<vmem>>, vector<16x1xf32>
    %16 = vector.broadcast %15 : vector<16x1xf32> to vector<16x128xf32>
    %17 = arith.addf %14, %16 : vector<16x128xf32>
    %18 = math.tanh %17 : vector<16x128xf32>
    %c0_15 = arith.constant 0 : index
    %c0_16 = arith.constant 0 : index
    %19 = vector.load %arg8[%c0_15, %c0_16] : memref<1x16xf32, #tpu.memory_space<vmem>>, vector<1x16xf32>
    %cst_17 = arith.constant dense<0.000000e+00> : vector<1x128xf32>
    %20 = tpu.matmul %19, %18, %cst_17 {dimension_numbers = #tpu.dot_dimension_numbers<[1], [0], [0], [1], [0, 0, 1, 1], [], []>} : vector<1x16xf32>, vector<16x128xf32>, vector<1x128xf32> -> vector<1x128xf32>
    %c0_18 = arith.constant 0 : index
    %c0_19 = arith.constant 0 : index
    %21 = vector.load %arg9[%c0_18, %c0_19] : memref<1x1xf32, #tpu.memory_space<vmem>>, vector<1x1xf32>
    %22 = vector.broadcast %21 : vector<1x1xf32> to vector<1x128xf32>
    %23 = arith.addf %20, %22 : vector<1x128xf32>
    %24 = arith.negf %23 : vector<1x128xf32>
    %25 = math.exp %24 : vector<1x128xf32>
    %cst_20 = arith.constant 1.000000e+00 : f32
    %26 = vector.broadcast %cst_20 : f32 to vector<1x128xf32>
    %27 = arith.addf %26, %25 : vector<1x128xf32>
    %28 = arith.divf %26, %27 : vector<1x128xf32>
    %c0_21 = arith.constant 0 : index
    %c0_22 = arith.constant 0 : index
    %29 = vector.load %arg10[%c0_21, %c0_22] : memref<1x128xf32, #tpu.memory_space<vmem>>, vector<1x128xf32>
    tpu.vector_store %arg10[%c0_21, %c0_22], %28 {strides = array<i32>} : memref<1x128xf32, #tpu.memory_space<vmem>>, vector<1x128xf32>,
    return
  }
  func.func @transform_0(%arg0: i32) -> (i32, i32) {
    %c0_i32 = arith.constant 0 : i32
    %c0_i32_0 = arith.constant 0 : i32
    return %arg0, %c0_i32 : i32, i32
  }
  func.func @transform_1(%arg0: i32) -> (i32, i32) {
    %c0_i32 = arith.constant 0 : i32
    %c0_i32_0 = arith.constant 0 : i32
    %c0_i32_1 = arith.constant 0 : i32
    return %c0_i32, %c0_i32_0 : i32, i32
  }
  func.func @transform_2(%arg0: i32) -> (i32, i32) {
    %c0_i32 = arith.constant 0 : i32
    %c0_i32_0 = arith.constant 0 : i32
    %c0_i32_1 = arith.constant 0 : i32
    return %c0_i32, %c0_i32_0 : i32, i32
  }
  func.func @transform_3(%arg0: i32) -> (i32, i32) {
    %c0_i32 = arith.constant 0 : i32
    %c0_i32_0 = arith.constant 0 : i32
    %c0_i32_1 = arith.constant 0 : i32
    return %c0_i32, %c0_i32_0 : i32, i32
  }
  func.func @transform_4(%arg0: i32) -> (i32, i32) {
    %c0_i32 = arith.constant 0 : i32
    %c0_i32_0 = arith.constant 0 : i32
    %c0_i32_1 = arith.constant 0 : i32
    return %c0_i32, %c0_i32_0 : i32, i32
  }
  func.func @transform_5(%arg0: i32) -> (i32, i32) {
    %c0_i32 = arith.constant 0 : i32
    %c0_i32_0 = arith.constant 0 : i32
    %c0_i32_1 = arith.constant 0 : i32
    return %c0_i32, %c0_i32_0 : i32, i32
  }
  func.func @transform_6(%arg0: i32) -> (i32, i32) {
    %c0_i32 = arith.constant 0 : i32
    %c0_i32_0 = arith.constant 0 : i32
    %c0_i32_1 = arith.constant 0 : i32
    return %c0_i32, %c0_i32_0 : i32, i32
  }
  func.func @transform_7(%arg0: i32) -> (i32, i32) {
    %c0_i32 = arith.constant 0 : i32
    %c0_i32_0 = arith.constant 0 : i32
    %c0_i32_1 = arith.constant 0 : i32
    return %c0_i32, %c0_i32_0 : i32, i32
  }
  func.func @transform_8(%arg0: i32) -> (i32, i32) {
    %c0_i32 = arith.constant 0 : i32
    %c0_i32_0 = arith.constant 0 : i32
    %c0_i32_1 = arith.constant 0 : i32
    return %c0_i32, %c0_i32_0 : i32, i32
  }
  func.func @transform_9(%arg0: i32) -> (i32, i32) {
    %c0_i32 = arith.constant 0 : i32
    %c0_i32_0 = arith.constant 0 : i32
    return %c0_i32, %arg0 : i32, i32
  }
}

</mosaic_0001>

<bundles_post_ra>
// kernel: tpu_custom_call.1
= control target key start
LH: loop header
LB: loop body
LE: loop exit
PB: predicated region body
PF: predicated region fallthrough
CT: control target
= control target key end

     0   :  { %s1089_s0 = inlined_call_operand.vmem [shape: f32[128,20], index: 0, kind: input, shape index: {}]   ;;  %s1090_s1 = inlined_call_operand.vmem [shape: f32[64,20], index: 1, kind: input, shape index: {}]   ;;  %s1091_s2 = inlined_call_operand.vmem [shape: f32[64,1], index: 2, kind: input, shape index: {}]   ;;  %s1092_s3 = inlined_call_operand.vmem [shape: f32[32,64], index: 3, kind: input, shape index: {}]   ;;  %s1093_s4 = inlined_call_operand.vmem [shape: f32[32,1], index: 4, kind: input, shape index: {}]   ;;  %s1094_s5 = inlined_call_operand.vmem [shape: f32[16,32], index: 5, kind: input, shape index: {}]   ;;  %s1095_s6 = inlined_call_operand.vmem [shape: f32[16,1], index: 6, kind: input, shape index: {}]   ;;  %s1096_s7 = inlined_call_operand.vmem [shape: f32[1,16], index: 7, kind: input, shape index: {}]   ;;  %s1097_s8 = inlined_call_operand.<no memory space> [shape: f32[1,1], index: 8, kind: input, shape index: {}]   ;;  %s1098_s9 = inlined_call_operand.hbm [shape: f32[1,128], index: 9, kind: output, shape index: {}]  }
   0x1   :  { %v14_v0 = vstv %s1097_s8 }
   0x2   :  { %15 = vst [vmem:[#allocation2] sm:$0x1] %v14_v0 }
   0x3   :  { %v50_v1 = vld [vmem:[%s1089_s0 + $0x78] sm:$0xff]  ;;  %vm107_vm0 = vcmask 162816   ;;  %v49_v2 = vld [vmem:[%s1089_s0 + $0x70] sm:$0xff]  ;;  %v848_v3 = vmov 0   ;;  %v48_v4 = vld [vmem:[%s1089_s0 + $0x68] sm:$0xff] }
   0x4   :  { %704 = vmatprep.subr.msk.mxu0 %vm107_vm0, %v50_v1  ;;  %792 = vset.pattern.permute.xlu0 %v848_v3  ;;  %v51_v5 = vld [vmem:[%s1090_s1] sm:$0xff]  ;;  %v66_v7 = vld [vmem:[%s1091_s2 + $0x38] sm:$0xff]  ;;  %v64_v8 = vld [vmem:[%s1091_s2 + $0x28] sm:$0xff] }
   0x5   :  { %705 = vmatpush3.xpose.msk.msra.mxu0 %vm107_vm0, %v50_v1  ;;  %793 = vset.pattern.permute.xlu1 %v848_v3  ;;  %v47_v6 = vld [vmem:[%s1089_s0 + $0x60] sm:$0xff]  ;;  %v65_v9 = vld [vmem:[%s1091_s2 + $0x30] sm:$0xff]  ;;  %v46_v11 = vld [vmem:[%s1089_s0 + $0x58] sm:$0xff] }
   0x6   :  { %706 = vmatprep.subr.msk.mxu0 %vm107_vm0, %v49_v2  ;;  %736 = vmatprep.mubr.msk.f32.mxu0 %vm107_vm0, %v51_v5  ;;  %v63_v10 = vld [vmem:[%s1091_s2 + $0x20] sm:$0xff] }
   0x7   :  { %104 = vperm.xlu0 %792, %v66_v7   ;;  %94 = vperm.xlu1 %793, %v64_v8  }
   0x9   :  { %707 = vmatpush3.xpose.msk.msra.mxu0 %vm107_vm0, %v49_v2 }
   0xa   :  { %708 = vmatprep.subr.msk.mxu0 %vm107_vm0, %v48_v4 }
   0xb   :  { %99 = vperm.xlu0 %792, %v65_v9   ;;  %89 = vperm.xlu1 %793, %v63_v10  }
   0xd   :  { %709 = vmatpush3.xpose.msk.msra.mxu0 %vm107_vm0, %v48_v4 }
   0xe   :  { %710 = vmatprep.subr.msk.mxu0 %vm107_vm0, %v47_v6 }
   0xf   :  { %16 = vsyncpa [#allocation4], 0  ;;  %v62_v12 = vld [vmem:[%s1091_s2 + $0x18] sm:$0xff]  ;;  %v61_v13 = vld [vmem:[%s1091_s2 + $0x10] sm:$0xff]  ;;  %vm321_vm1 = vcmask 523264   ;;  %vm437_vm2 = vcmask 261120  }
  0x10   :  { %v45_v14 = vld [vmem:[%s1089_s0 + $0x50] sm:$0xff]  ;;  %84 = vperm.xlu0 %792, %v62_v12   ;;  %79 = vperm.xlu1 %793, %v61_v13   ;;  %v60_v15 = vld [vmem:[%s1091_s2 + $0x8] sm:$0xff]  ;;  %v59_v16 = vld [vmem:[%s1091_s2] sm:$0xff]  ;;  %vm850_vm3 = vmmov 0   ;;  %vm532_vm4 = vcmask 130048   ;;  %s851_s2 = smov [#allocation3]  }
  0x11   :  { %711 = vmatpush3.xpose.msk.msra.mxu0 %vm107_vm0, %v47_v6  ;;  %v44_v17 = vld [vmem:[%s1089_s0 + $0x48] sm:$0xff]  ;;  %v300_v18 = vld [vmem:[%s1093_s4 + $0x18] sm:$0xff]  ;;  %v299_v19 = vld [vmem:[%s1093_s4 + $0x10] sm:$0xff] }
  0x12   :  { %712 = vmatprep.subr.msk.mxu0 %vm107_vm0, %v46_v11  ;;  %v43_v20 = vld [vmem:[%s1089_s0 + $0x40] sm:$0xff]  ;;  %v298_v21 = vld [vmem:[%s1093_s4 + $0x8] sm:$0xff]  ;;  %v42_v23 = vld [vmem:[%s1089_s0 + $0x38] sm:$0xff] }
  0x13   :  { %v297_v22 = vld [vmem:[%s1093_s4] sm:$0xff]  ;;  %v426_v24 = vld [vmem:[%s1095_s6 + $0x8] sm:$0xff]  ;;  %v41_v26 = vld [vmem:[%s1089_s0 + $0x30] sm:$0xff] }
  0x14   :  { %74 = vperm.xlu0 %792, %v60_v15   ;;  %69 = vperm.xlu1 %793, %v59_v16   ;;  %v425_v25 = vld [vmem:[%s1095_s6] sm:$0xff]  ;;  %v40_v28 = vld [vmem:[%s1089_s0 + $0x28] sm:$0xff]  ;;  %v38_v30 = vld [vmem:[%s1089_s0 + $0x18] sm:$0xff] }
  0x15   :  { %713 = vmatpush3.xpose.msk.msra.mxu0 %vm107_vm0, %v46_v11  ;;  %v522_v27 = vld [vmem:[#allocation2] sm:$0x1]  ;;  %v37_v31 = vld [vmem:[%s1089_s0 + $0x10] sm:$0xff]  ;;  %v36_v32 = vld [vmem:[%s1089_s0 + $0x8] sm:$0xff] }
  0x16   :  { %714 = vmatprep.subr.msk.mxu0 %vm107_vm0, %v45_v14  ;;  %v39_v29 = vld [vmem:[%s1089_s0 + $0x20] sm:$0xff]  ;;  %v52_v34 = vld [vmem:[%s1090_s1 + $0x8] sm:$0xff]  ;;  %v53_v35 = vld [vmem:[%s1090_s1 + $0x10] sm:$0xff] }
  0x17   :  { %v35_v33 = vld [vmem:[%s1089_s0] sm:$0xff]  ;;  %v54_v36 = vld [vmem:[%s1090_s1 + $0x18] sm:$0xff]  ;;  %v56_v38 = vld [vmem:[%s1090_s1 + $0x28] sm:$0xff] }
  0x18   :  { %318 = vperm.xlu0 %792, %v300_v18   ;;  %313 = vperm.xlu1 %793, %v299_v19   ;;  %v55_v37 = vld [vmem:[%s1090_s1 + $0x20] sm:$0xff]  ;;  %v57_v39 = vld [vmem:[%s1090_s1 + $0x30] sm:$0xff]  ;;  %v58_v40 = vld [vmem:[%s1090_s1 + $0x38] sm:$0xff] }
  0x19   :  { %715 = vmatpush3.xpose.msk.msra.mxu0 %vm107_vm0, %v45_v14  ;;  %v293_v41 = vld [vmem:[%s1092_s3] sm:$0xff]  ;;  %v294_v10 = vld [vmem:[%s1092_s3 + $0x8] sm:$0xff]  ;;  %v295_v11 = vld [vmem:[%s1092_s3 + $0x10] sm:$0xff] }
  0x1a   :  { %716 = vmatprep.subr.msk.mxu0 %vm107_vm0, %v44_v17  ;;  %764 = vmatprep.mubr.msk.f32.mxu1 %vm321_vm1, %v293_v41  ;;  %v296_v12 = vld [vmem:[%s1092_s3 + $0x18] sm:$0xff]  ;;  %v423_v13 = vld [vmem:[%s1094_s5] sm:$0xff]  ;;  %v528_v41 = vlaneseq }
  0x1c   :  { %308 = vperm.xlu0 %792, %v298_v21   ;;  %303 = vperm.xlu1 %793, %v297_v22  }
  0x1d   :  { %717 = vmatpush3.xpose.msk.msra.mxu0 %vm107_vm0, %v44_v17 }
  0x1e   :  { %718 = vmatprep.subr.msk.mxu0 %vm107_vm0, %v43_v20 }
  0x20   :  { %434 = vperm.xlu0 %792, %v426_v24   ;;  %429 = vperm.xlu1 %793, %v425_v25  }
  0x21   :  { %719 = vmatpush3.xpose.msk.msra.mxu0 %vm107_vm0, %v43_v20 }
  0x22   :  { %720 = vmatprep.subr.msk.mxu0 %vm107_vm0, %v42_v23 }
  0x24   :  { %525 = vperm.xlu0 %792, %v522_v27  }
  0x25   :  { %721 = vmatpush3.xpose.msk.msra.mxu0 %vm107_vm0, %v42_v23 }
  0x26   :  { %722 = vmatprep.subr.msk.mxu0 %vm107_vm0, %v41_v26 }
  0x29   :  { %723 = vmatpush3.xpose.msk.msra.mxu0 %vm107_vm0, %v41_v26 }
  0x2a   :  { %724 = vmatprep.subr.msk.mxu0 %vm107_vm0, %v40_v28 }
  0x2d   :  { %725 = vmatpush3.xpose.msk.msra.mxu0 %vm107_vm0, %v40_v28 }
  0x2e   :  { %726 = vmatprep.subr.msk.mxu0 %vm107_vm0, %v39_v29 }
  0x31   :  { %727 = vmatpush3.xpose.msk.msra.mxu0 %vm107_vm0, %v39_v29 }
  0x32   :  { %728 = vmatprep.subr.msk.mxu0 %vm107_vm0, %v38_v30 }
  0x35   :  { %729 = vmatpush3.xpose.msk.msra.mxu0 %vm107_vm0, %v38_v30  ;;  %v424_v30 = vld [vmem:[%s1094_s5 + $0x8] sm:$0xff] }
  0x36   :  { %730 = vmatprep.subr.msk.mxu0 %vm107_vm0, %v37_v31 }
  0x39   :  { %731 = vmatpush3.xpose.msk.msra.mxu0 %vm107_vm0, %v37_v31  ;;  %v849_v31 = vmov 0.0  }
  0x3a   :  { %732 = vmatprep.subr.msk.mxu0 %vm107_vm0, %v36_v32 }
  0x3d   :  { %733 = vmatpush3.xpose.msk.msra.mxu0 %vm107_vm0, %v36_v32 }
  0x3e   :  { %734 = vmatprep.subr.msk.mxu0 %vm107_vm0, %v35_v33 }
  0x41   :  { %735 = vmatpush3.xpose.msk.msra.mxu0 %vm107_vm0, %v35_v33 }
  0x44   :  { %737 = vmatmul.mubr.msk.f32.vlgmr.msra.gmra.mxu0 %vm107_vm0, %v52_v34 }
  0x45   :  { %739 = vmatprep.mubr.msk.f32.mxu0 %vm107_vm0, %v53_v35 }
  0x48   :  { %740 = vmatmul.mubr.msk.f32.gmra.mxu0 %vm107_vm0, %v54_v36 }
  0x49   :  { %742 = vmatprep.mubr.msk.f32.mxu0 %vm107_vm0, %v55_v37 }
  0x4c   :  { %743 = vmatmul.mubr.msk.f32.gmra.mxu0 %vm107_vm0, %v56_v38 }
  0x4d   :  { %745 = vmatprep.mubr.msk.f32.mxu0 %vm107_vm0, %v57_v39  ;;  %v521_v39 = vld [vmem:[%s1096_s7] sm:$0x1]  ;;  %s619_s7 = sshll.u32 %s851_s2, 4  ;;  %s620_s7 = int_to_ptr.vmem [resolvable:$true] %s619_s7 }
  0x4e   :  { %s826_s24 = scalar_lea.vmem %s620_s7, 16  ;;  %s830_s25 = scalar_lea.vmem %s620_s7, 32 }
  0x4f   :  { %p827_p0 = scmp.ne.s32.totalorder %s620_s7, %s826_s24  ;;  %p831_p1 = scmp.lt.s32.totalorder %s620_s7, %s620_s7 }
  0x50   :  { %746 = vmatmul.mubr.msk.f32.gmra.mxu0 %vm107_vm0, %v58_v40  ;;  %p832_p2 = scmp.lt.s32.totalorder %s830_s25, %s826_s24 }
  0x52   :  { %p833_p3 = por %p832_p2, %p831_p1 }
  0x54   :  { %p834_p4 = pnand %p833_p3, %p827_p0 }
  0x82   :  { %v105_v44 = vpop.permute.xlu0 %104  ;;  %v95_v45 = vpop.permute.xlu1 %94 }
  0x86   :  { %v100_v49 = vpop.permute.xlu0 %99  ;;  %v90_v50 = vpop.permute.xlu1 %89 }
  0x8b   :  { %v85_v57 = vpop.permute.xlu0 %84  ;;  %v80_v58 = vpop.permute.xlu1 %79 }
  0x8f   :  { %v75_v62 = vpop.permute.xlu0 %74  ;;  %v70_v63 = vpop.permute.xlu1 %69 }
  0x93   :  { %v319_v14 = vpop.permute.xlu0 %318  ;;  %v314_v16 = vpop.permute.xlu1 %313 }
  0x97   :  { %v309_v20 = vpop.permute.xlu0 %308  ;;  %v304_v24 = vpop.permute.xlu1 %303 }
  0x9b   :  { %v435_v32 = vpop.permute.xlu0 %434  ;;  %v430_v35 = vpop.permute.xlu1 %429 }
 0x104   :  { %v738_v42 = vpop.f32.mrf.mxu0 }
 0x105   :  { %v252_v0 = vadd.f32 %v738_v42, %v75_v62  ;;  %v529_v42 = vshrl.u32 %v528_v41, 7 }
 0x106   :  { %v246_v43 = vpop.f32.mrf.mxu0 }
 0x107   :  { %v247_v1 = vadd.f32 %v246_v43, %v70_v63  ;;  %v530_v43 = vsub.s32 0, %v529_v42 }
 0x108   :  { %v741_v46 = vpop.f32.mrf.mxu0 }
 0x109   :  { %v262_v60 = vadd.f32 %v741_v46, %v85_v57 }
 0x10a   :  { %v256_v47 = vpop.f32.mrf.mxu0 }
 0x10b   :  { %v257_v61 = vadd.f32 %v256_v47, %v80_v58 }
 0x10c   :  { %v744_v48 = vpop.f32.mrf.mxu0 }
 0x10d   :  { %v272_v55 = vadd.f32 %v744_v48, %v95_v45 }
 0x10e   :  { %v266_v51 = vpop.f32.mrf.mxu0 }
 0x10f   :  { %v267_v59 = vadd.f32 %v266_v51, %v90_v50 }
 0x110   :  { %v747_v52 = vpop.f32.mrf.mxu0 }
 0x111   :  { %v282_v53 = vadd.f32 %v747_v52, %v105_v44  ;;  %v526_v44 = vpop.permute.xlu0 %525 }
 0x112   :  { %v276_v54 = vpop.f32.mrf.mxu0  ;;  %v531_v45 = vrot.slane %v526_v44, %v530_v43 }
 0x113   :  { %794 = vtanh.f32 %v282_v53  ;;  %v277_v56 = vadd.f32 %v276_v54, %v100_v49 }
 0x115   :  { %796 = vtanh.f32 %v277_v56 }
 0x116   :  { %798 = vtanh.f32 %v272_v55 }
 0x117   :  { %800 = vtanh.f32 %v267_v59 }
 0x118   :  { %802 = vtanh.f32 %v262_v60 }
 0x119   :  { %804 = vtanh.f32 %v257_v61 }
 0x11a   :  { %806 = vtanh.f32 %v252_v0 }
 0x11b   :  { %808 = vtanh.f32 %v247_v1 }
 0x120   :  { %v795_v2 = vpop.eup %794 }
 0x121   :  { %748 = vmatprep.subr.mxu1 %v795_v2 }
 0x122   :  { %v797_v3 = vpop.eup %796  ;;  %749 = vmatpush3.msra.mxu1 %v795_v2 }
 0x123   :  { %750 = vmatprep.subr.mxu1 %v797_v3  ;;  %v799_v4 = vpop.eup %798 }
 0x124   :  { %751 = vmatpush3.msra.mxu1 %v797_v3  ;;  %v801_v5 = vpop.eup %800 }
 0x125   :  { %752 = vmatprep.subr.mxu1 %v799_v4  ;;  %v803_v6 = vpop.eup %802 }
 0x126   :  { %753 = vmatpush3.msra.mxu1 %v799_v4  ;;  %v805_v7 = vpop.eup %804 }
 0x127   :  { %754 = vmatprep.subr.mxu1 %v801_v5  ;;  %v807_v8 = vpop.eup %806 }
 0x128   :  { %755 = vmatpush3.msra.mxu1 %v801_v5  ;;  %v809_v9 = vpop.eup %808 }
 0x129   :  { %756 = vmatprep.subr.mxu1 %v803_v6 }
 0x12a   :  { %757 = vmatpush3.msra.mxu1 %v803_v6 }
 0x12b   :  { %758 = vmatprep.subr.mxu1 %v805_v7 }
 0x12c   :  { %759 = vmatpush3.msra.mxu1 %v805_v7 }
 0x12d   :  { %760 = vmatprep.subr.mxu1 %v807_v8 }
 0x12e   :  { %761 = vmatpush3.msra.mxu1 %v807_v8 }
 0x12f   :  { %762 = vmatprep.subr.mxu1 %v809_v9 }
 0x130   :  { %763 = vmatpush3.msra.mxu1 %v809_v9 }
 0x131   :  { %765 = vmatmul.mubr.msk.f32.vlgmr.msra.gmra.mxu1 %vm321_vm1, %v294_v10 }
 0x132   :  { %767 = vmatprep.mubr.msk.f32.mxu1 %vm321_vm1, %v295_v11 }
 0x135   :  { %768 = vmatmul.mubr.msk.f32.gmra.mxu1 %vm321_vm1, %v296_v12 }
 0x136   :  { %778 = vmatprep.mubr.msk.f32.mxu1 %vm437_vm2, %v423_v13 }
 0x1f1   :  { %v766_v15 = vpop.f32.mrf.mxu1 }
 0x1f2   :  { %v406_v22 = vadd.f32 %v766_v15, %v309_v20 }
 0x1f3   :  { %v400_v17 = vpop.f32.mrf.mxu1 }
 0x1f4   :  { %v401_v25 = vadd.f32 %v400_v17, %v304_v24 }
 0x1f5   :  { %v769_v18 = vpop.f32.mrf.mxu1 }
 0x1f6   :  { %v416_v19 = vadd.f32 %v769_v18, %v319_v14 }
 0x1f7   :  { %v410_v21 = vpop.f32.mrf.mxu1 }
 0x1f8   :  { %810 = vtanh.f32 %v416_v19  ;;  %v411_v23 = vadd.f32 %v410_v21, %v314_v16 }
 0x1fa   :  { %812 = vtanh.f32 %v411_v23 }
 0x1fb   :  { %814 = vtanh.f32 %v406_v22 }
 0x1fc   :  { %816 = vtanh.f32 %v401_v25 }
 0x205   :  { %v811_v26 = vpop.eup %810 }
 0x206   :  { %770 = vmatprep.subr.mxu1 %v811_v26 }
 0x207   :  { %v813_v27 = vpop.eup %812  ;;  %771 = vmatpush3.msra.mxu1 %v811_v26 }
 0x208   :  { %772 = vmatprep.subr.mxu1 %v813_v27  ;;  %v815_v28 = vpop.eup %814 }
 0x209   :  { %773 = vmatpush3.msra.mxu1 %v813_v27  ;;  %v817_v29 = vpop.eup %816 }
 0x20a   :  { %774 = vmatprep.subr.mxu1 %v815_v28 }
 0x20b   :  { %775 = vmatpush3.msra.mxu1 %v815_v28 }
 0x20c   :  { %776 = vmatprep.subr.mxu1 %v817_v29 }
 0x20d   :  { %777 = vmatpush3.msra.mxu1 %v817_v29 }
 0x20e   :  { %779 = vmatmul.mubr.msk.f32.vlgmr.msra.gmra.mxu1 %vm437_vm2, %v424_v30  ;;  %781 = vmatprep.subr.mxu1 %v849_v31 }
 0x20f   :  { %785 = vmatprep.mubr.msk.f32.mxu1 %vm850_vm3, %v849_v31 }
 0x2ce   :  { %v780_v33 = vpop.f32.mrf.mxu1 }
 0x2cf   :  { %v516_v34 = vadd.f32 %v780_v33, %v435_v32 }
 0x2d0   :  { %v510_v36 = vpop.f32.mrf.mxu1 }
 0x2d1   :  { %818 = vtanh.f32 %v516_v34  ;;  %v511_v37 = vadd.f32 %v510_v36, %v430_v35 }
 0x2d3   :  { %820 = vtanh.f32 %v511_v37 }
 0x2de   :  { %v819_v38 = vpop.eup %818 }
 0x2df   :  { %782 = vmatpush3.msra.mxu1 %v819_v38 }
 0x2e0   :  { %v821_v40 = vpop.eup %820  ;;  %783 = vmatprep.subr.mxu1 %v849_v31 }
 0x2e1   :  { %784 = vmatpush3.msra.mxu1 %v821_v40 }
 0x2e2   :  { %786 = vmatmul.mubr.msk.f32.vlgmr.msra.gmra.mxu1 %vm532_vm4, %v521_v39 }
 0x3a2   :  { %v602_v46 = vpop.f32.mrf.mxu1 }
 0x3a3   :  { %v603_v47 = vadd.f32 %v602_v46, %v531_v45 }
 0x3a4   :  { %v787_v48 = vpop.f32.mrf.mxu1 }
 0x3a5   :  { %v658_v49 = vmul.f32 -1.442695, %v603_v47 }
 0x3a7   :  { %822 = vpow2.f32 %v658_v49 }
 0x3b4   :  { %v823_v50 = vpop.eup %822 }
 0x3b5   :  { %v609_v51 = vadd.f32 1.0, %v823_v50 }
 0x3b7   :  { %824 = vrcp.f32 %v609_v51 }
 0x3c4   :  { %v825_v52 = vpop.eup %824 }
 0x3c5   :  { %612 = vst [vmem:[#allocation3] sm:$0x1] %v825_v52 }
 0x3c6   :  { %837 = shalt.err (!%p834_p4)
}
 0x3c7   :  { %622 = dma.vmem_to_hbm [thread:$0]  %s620_s7, 16, %s1098_s9, [#allocation4]  }
 0x3c8   :  { %846 = dma.done.wait [#allocation4], 16  }
 0x3c9   :  { %847 = vsyncadd [#allocation4], 4294967280 }
 0x3ca   :  { %626 = vsyncpa [#allocation4], 1 }

</bundles_post_ra>
